<compile_context>
chip_gen: v5e
topology: v5e:2x2
jax: 0.10.0
libtpu: 0.0.40
codegen_flags: <defaults>
</compile_context>

<pallas_src>
import jax
import jax.numpy as jnp
from jax.experimental import pallas as pl
from jax.experimental.pallas import tpu as pltpu

HIDDEN = 5     # nn.Linear(in_dim, 5)
LANE = 128     # pad internal feature dims to one full lane width


def _round_up(n, m):
    return ((n + m - 1) // m) * m


def net_kernel(x_ref, w1_ref, b1_ref, w2_ref, b2_ref, o_ref):
    # layer1: Linear(in_dim, HIDDEN); hidden columns zero-padded to 128 lanes. ReLU.
    h = jnp.dot(x_ref[...], w1_ref[...], preferred_element_type=jnp.float32)
    h = jnp.maximum(h + b1_ref[...], 0.0)

    # layer2: Linear(HIDDEN, out_dim); columns zero-padded to 128 lanes internally.
    logits = jnp.dot(h.astype(w2_ref.dtype), w2_ref[...],
                     preferred_element_type=jnp.float32) + b2_ref[...]

    # Keep only the real logit columns before the softmax (the padded columns never reach HBM).
    out_dim = o_ref.shape[-1]
    logits = logits[:, :out_dim]

    # Numerically stable softmax with one EXACT divide per row (rows sum to 1 to f32 precision).
    m = jnp.max(logits, axis=-1, keepdims=True)
    e = jnp.exp(logits - m)
    s = jnp.sum(e, axis=-1, keepdims=True)
    o_ref[...] = (e * (1.0 / s)).astype(o_ref.dtype)


def net_forward(x, w1, b1, w2, b2, *, block_rows=8192, compute_dtype=None):
    """x: (B, in_dim). w1: (in_dim, HIDDEN), b1: (HIDDEN,)/(1, HIDDEN),
    w2: (HIDDEN, out_dim), b2: (out_dim,)/(1, out_dim).
    compute_dtype: matmul input dtype; pass jnp.bfloat16 on v5e (bf16-native MXU,
    halves the x read). Accumulation / biases / softmax are always f32."""
    B, in_dim = x.shape
    out_dim = w2.shape[1]
    cdt = jnp.float32 if compute_dtype is None else compute_dtype

    x = x.astype(cdt)
    w1 = w1.astype(cdt)
    w2 = w2.astype(cdt)
    b1 = jnp.reshape(b1, (1, -1)).astype(jnp.float32)
    b2 = jnp.reshape(b2, (1, -1)).astype(jnp.float32)

    # ---- pad internal feature dims to full 128-lane slabs (kernel-internal only) ----
    hp = _round_up(HIDDEN, LANE)
    op = _round_up(out_dim, LANE)
    w1p = jnp.zeros((in_dim, hp), cdt).at[:, :HIDDEN].set(w1)
    b1p = jnp.zeros((1, hp), jnp.float32).at[:, :HIDDEN].set(b1)
    w2p = jnp.zeros((hp, op), cdt).at[:HIDDEN, :out_dim].set(w2)
    b2p = jnp.zeros((1, op), jnp.float32).at[:, :out_dim].set(b2)

    # ---- batch tiling: biggest tile that fits, multiple of 8 sublanes; ragged last block is
    # handled by Pallas (no jnp.pad -> no extra HBM copy of x) ----
    tb = min(block_rows, _round_up(B, 8))
    grid = (pl.cdiv(B, tb),)

    cost = pl.CostEstimate(
        flops=2 * B * in_dim * hp + 2 * B * hp * op,
        transcendentals=B * out_dim,
        bytes_accessed=B * in_dim * jnp.dtype(cdt).itemsize          # x read
        + B * out_dim * 4                                            # narrowed output write
        + (in_dim * hp + hp * op) * jnp.dtype(cdt).itemsize          # weights (read once)
        + (hp + op) * 4,                                             # biases
    )

    return pl.pallas_call(
        net_kernel,
        out_shape=jax.ShapeDtypeStruct((B, out_dim), jnp.float32),
        grid=grid,
        in_specs=[
            pl.BlockSpec((tb, in_dim), lambda i: (i, 0)),   # x: streamed per batch tile
            pl.BlockSpec((in_dim, hp), lambda i: (0, 0)),   # w1: resident across grid steps
            pl.BlockSpec((1, hp), lambda i: (0, 0)),        # b1: resident
            pl.BlockSpec((hp, op), lambda i: (0, 0)),       # w2: resident
            pl.BlockSpec((1, op), lambda i: (0, 0)),        # b2: resident
        ],
        out_specs=pl.BlockSpec((tb, out_dim), lambda i: (i, 0)),
        compiler_params=pltpu.CompilerParams(
            dimension_semantics=("parallel",),      # shard batch tiles across TCs on v7x
            vmem_limit_bytes=32 * 1024 * 1024,      # > v5e 16 MiB scoped default, safe on v7x
        ),
        cost_estimate=cost,
    )(x, w1p, b1p, w2p, b2p)


def init_params(key, in_dim, out_dim):
    """Deterministic init mimicking PyTorch Linear default (uniform +/- 1/sqrt(fan_in)).
    Weights stored as (in_features, out_features), i.e. transposed vs. torch."""
    k1, k2, k3, k4 = jax.random.split(key, 4)
    bound1 = 1.0 / jnp.sqrt(jnp.float32(in_dim))
    bound2 = 1.0 / jnp.sqrt(jnp.float32(HIDDEN))
    w1 = jax.random.uniform(k1, (in_dim, HIDDEN), jnp.float32, -bound1, bound1)
    b1 = jax.random.uniform(k2, (1, HIDDEN), jnp.float32, -bound1, bound1)
    w2 = jax.random.uniform(k3, (HIDDEN, out_dim), jnp.float32, -bound2, bound2)
    b2 = jax.random.uniform(k4, (1, out_dim), jnp.float32, -bound2, bound2)
    return w1, b1, w2, b2


def reference_forward(x, w1, b1, w2, b2):
    x = x.astype(jnp.float32)
    h = jnp.maximum(x @ w1 + b1, 0.0)
    logits = h @ w2 + b2
    return jax.nn.softmax(logits, axis=1)


# TODO(synk): Adam / ReduceLROnPlateau from the original file are training-time utilities,
# not part of the forward pass, and are intentionally not translated.

if __name__ == "__main__":
    key = jax.random.PRNGKey(0)
    kx, kp = jax.random.split(key)

    batch, in_dim, out_dim = 8, 16, 4
    x = jax.random.normal(kx, (batch, in_dim), dtype=jnp.float32)
    w1, b1, w2, b2 = init_params(kp, in_dim, out_dim)

    out = net_forward(x, w1, b1, w2, b2)
    out = jax.block_until_ready(out)

    ref = reference_forward(x, w1, b1, w2, b2)
    assert out.shape == (batch, out_dim)
    assert jnp.allclose(out, ref, atol=1e-4, rtol=1e-4)
    # exact per-row normalization -> rows sum to 1 to f32 precision
    assert jnp.allclose(jnp.sum(out, axis=1), 1.0, atol=1e-4)

    print("KERNEL_OK")
</pallas_src>

<mosaic_0001>
module attributes {stable_mosaic.version = 11 : i64} {
  func.func @net_kernel(%arg0: i32, %arg1: memref<8x16xf32, #tpu.memory_space<vmem>>, %arg2: memref<16x128xf32, #tpu.memory_space<vmem>>, %arg3: memref<1x128xf32, #tpu.memory_space<vmem>>, %arg4: memref<128x128xf32, #tpu.memory_space<vmem>>, %arg5: memref<1x128xf32, #tpu.memory_space<vmem>>, %arg6: memref<8x4xf32, #tpu.memory_space<vmem>>) attributes {dimension_semantics = [#tpu.dimension_semantics<parallel>], iteration_bounds = array<i64: 1>, scalar_prefetch = 0 : i64, scratch_operands = 0 : i64, tpu.core_type = #tpu.core_type<tc>, window_params = [{transform_indices = @transform_0, window_bounds = array<i64: 8, 16>}, {pipeline_mode = #tpu.pipeline_mode<synchronous>, transform_indices = @transform_1, window_bounds = array<i64: 16, 128>}, {pipeline_mode = #tpu.pipeline_mode<synchronous>, transform_indices = @transform_2, window_bounds = array<i64: 1, 128>}, {pipeline_mode = #tpu.pipeline_mode<synchronous>, transform_indices = @transform_3, window_bounds = array<i64: 128, 128>}, {pipeline_mode = #tpu.pipeline_mode<synchronous>, transform_indices = @transform_4, window_bounds = array<i64: 1, 128>}, {transform_indices = @transform_5, window_bounds = array<i64: 8, 4>}]} {
    %c0 = arith.constant 0 : index
    %c0_0 = arith.constant 0 : index
    %0 = vector.load %arg1[%c0, %c0_0] : memref<8x16xf32, #tpu.memory_space<vmem>>, vector<8x16xf32>
    %c0_1 = arith.constant 0 : index
    %c0_2 = arith.constant 0 : index
    %1 = vector.load %arg2[%c0_1, %c0_2] : memref<16x128xf32, #tpu.memory_space<vmem>>, vector<16x128xf32>
    %cst = arith.constant dense<0.000000e+00> : vector<8x128xf32>
    %2 = tpu.matmul %0, %1, %cst {dimension_numbers = #tpu.dot_dimension_numbers<[1], [0], [0], [1], [0, 0, 1, 1], [], []>} : vector<8x16xf32>, vector<16x128xf32>, vector<8x128xf32> -> vector<8x128xf32>
    %c0_3 = arith.constant 0 : index
    %c0_4 = arith.constant 0 : index
    %3 = vector.load %arg3[%c0_3, %c0_4] : memref<1x128xf32, #tpu.memory_space<vmem>>, vector<1x128xf32>
    %4 = vector.broadcast %3 : vector<1x128xf32> to vector<8x128xf32>
    %5 = arith.addf %2, %4 : vector<8x128xf32>
    %cst_5 = arith.constant 0.000000e+00 : f32
    %6 = vector.broadcast %cst_5 : f32 to vector<8x128xf32>
    %7 = arith.maximumf %5, %6 : vector<8x128xf32>
    %c0_6 = arith.constant 0 : index
    %c0_7 = arith.constant 0 : index
    %8 = vector.load %arg4[%c0_6, %c0_7] : memref<128x128xf32, #tpu.memory_space<vmem>>, vector<128x128xf32>
    %cst_8 = arith.constant dense<0.000000e+00> : vector<8x128xf32>
    %9 = tpu.matmul %7, %8, %cst_8 {dimension_numbers = #tpu.dot_dimension_numbers<[1], [0], [0], [1], [0, 0, 1, 1], [], []>} : vector<8x128xf32>, vector<128x128xf32>, vector<8x128xf32> -> vector<8x128xf32>
    %c0_9 = arith.constant 0 : index
    %c0_10 = arith.constant 0 : index
    %10 = vector.load %arg5[%c0_9, %c0_10] : memref<1x128xf32, #tpu.memory_space<vmem>>, vector<1x128xf32>
    %11 = vector.broadcast %10 : vector<1x128xf32> to vector<8x128xf32>
    %12 = arith.addf %9, %11 : vector<8x128xf32>
    %13 = vector.extract_strided_slice %12 {offsets = [0, 0], sizes = [8, 4], strides = [1, 1]} : vector<8x128xf32> to vector<8x4xf32>
    %cst_11 = arith.constant dense<0xFF800000> : vector<8xf32>
    %14 = vector.multi_reduction <maximumf>, %13, %cst_11 [1] : vector<8x4xf32> to vector<8xf32>
    %15 = vector.shape_cast %14 : vector<8xf32> to vector<8x1xf32>
    %16 = vector.broadcast %15 : vector<8x1xf32> to vector<8x4xf32>
    %17 = arith.subf %13, %16 : vector<8x4xf32>
    %18 = math.exp %17 : vector<8x4xf32>
    %cst_12 = arith.constant dense<0.000000e+00> : vector<8xf32>
    %19 = vector.multi_reduction <add>, %18, %cst_12 [1] : vector<8x4xf32> to vector<8xf32>
    %20 = vector.shape_cast %19 : vector<8xf32> to vector<8x1xf32>
    %cst_13 = arith.constant 1.000000e+00 : f32
    %21 = vector.broadcast %cst_13 : f32 to vector<8x1xf32>
    %22 = arith.divf %21, %20 : vector<8x1xf32>
    %23 = vector.broadcast %22 : vector<8x1xf32> to vector<8x4xf32>
    %24 = arith.mulf %18, %23 : vector<8x4xf32>
    %c0_14 = arith.constant 0 : index
    %c0_15 = arith.constant 0 : index
    %25 = vector.load %arg6[%c0_14, %c0_15] : memref<8x4xf32, #tpu.memory_space<vmem>>, vector<8x4xf32>
    tpu.vector_store %arg6[%c0_14, %c0_15], %24 {strides = array<i32>} : memref<8x4xf32, #tpu.memory_space<vmem>>, vector<8x4xf32>,
    return
  }
  func.func @transform_0(%arg0: i32) -> (i32, i32) {
    %c0_i32 = arith.constant 0 : i32
    %c0_i32_0 = arith.constant 0 : i32
    return %arg0, %c0_i32 : i32, i32
  }
  func.func @transform_1(%arg0: i32) -> (i32, i32) {
    %c0_i32 = arith.constant 0 : i32
    %c0_i32_0 = arith.constant 0 : i32
    %c0_i32_1 = arith.constant 0 : i32
    return %c0_i32, %c0_i32_0 : i32, i32
  }
  func.func @transform_2(%arg0: i32) -> (i32, i32) {
    %c0_i32 = arith.constant 0 : i32
    %c0_i32_0 = arith.constant 0 : i32
    %c0_i32_1 = arith.constant 0 : i32
    return %c0_i32, %c0_i32_0 : i32, i32
  }
  func.func @transform_3(%arg0: i32) -> (i32, i32) {
    %c0_i32 = arith.constant 0 : i32
    %c0_i32_0 = arith.constant 0 : i32
    %c0_i32_1 = arith.constant 0 : i32
    return %c0_i32, %c0_i32_0 : i32, i32
  }
  func.func @transform_4(%arg0: i32) -> (i32, i32) {
    %c0_i32 = arith.constant 0 : i32
    %c0_i32_0 = arith.constant 0 : i32
    %c0_i32_1 = arith.constant 0 : i32
    return %c0_i32, %c0_i32_0 : i32, i32
  }
  func.func @transform_5(%arg0: i32) -> (i32, i32) {
    %c0_i32 = arith.constant 0 : i32
    %c0_i32_0 = arith.constant 0 : i32
    return %arg0, %c0_i32 : i32, i32
  }
}

</mosaic_0001>

<bundles_post_ra>
// kernel: tpu_custom_call.1
= control target key start
LH: loop header
LB: loop body
LE: loop exit
PB: predicated region body
PF: predicated region fallthrough
CT: control target
= control target key end

     0   :  { %10 = vsyncpa [#allocation3], 0  ;;  %s314_s0 = inlined_call_operand.hbm [shape: f32[8,16], index: 0, kind: input, shape index: {}]   ;;  %s315_s1 = inlined_call_operand.hbm [shape: f32[16,128], index: 1, kind: input, shape index: {}]   ;;  %s316_s2 = inlined_call_operand.vmem [shape: f32[1,128], index: 2, kind: input, shape index: {}]   ;;  %s317_s3 = inlined_call_operand.hbm [shape: f32[128,128], index: 3, kind: input, shape index: {}]   ;;  %s318_s4 = inlined_call_operand.vmem [shape: f32[1,128], index: 4, kind: input, shape index: {}]   ;;  %s319_s5 = inlined_call_operand.vmem [shape: f32[8,4], index: 5, kind: output, shape index: {}]  }
   0x1   :  { %11 = vsyncpa [#allocation5], 0  ;;  %s27_s20 = sshll.u32 %s315_s1, 4  ;;  %s258_s21 = smov [#allocation4]   ;;  %s28_s20 = int_to_ptr.hbm [resolvable:$true] %s27_s20 }
   0x2   :  { %s29_s22 = sshll.u32 %s258_s21, 4  ;;  %s17_s25 = sshll.u32 %s314_s0, 4  ;;  %s30_s22 = int_to_ptr.vmem [resolvable:$true] %s29_s22  ;;  %s18_s25 = int_to_ptr.hbm [resolvable:$true] %s17_s25 }
   0x3   :  { %s259_s26 = smov 128   ;;  %s260_s27 = smov 8  }
   0x4   :  { %35 = dma.hbm_to_vmem [thread:$0]  %s28_s20, 256, %s30_s22, [#allocation5], %s259_s26, %s259_s26, %s260_s27  }
   0x5   :  { %s261_s28 = smov [#allocation2]   ;;  %s42_s7 = sshll.u32 %s317_s3, 4  ;;  %s43_s7 = int_to_ptr.hbm [resolvable:$true] %s42_s7 }
   0x6   :  { %s19_s29 = sshll.u32 %s261_s28, 4  ;;  %s262_s1 = smov [#allocation6]   ;;  %s20_s29 = int_to_ptr.vmem [resolvable:$true] %s19_s29 }
   0x7   :  { %22 = dma.hbm_to_vmem [thread:$0]  %s18_s25, 128, %s20_s29, [#allocation3]  }
   0x8   :  { %s44_s8 = sshll.u32 %s262_s1, 4  ;;  %s45_s8 = int_to_ptr.vmem [resolvable:$true] %s44_s8 }
   0x9   :  { %50 = dma.hbm_to_vmem [thread:$0]  %s43_s7, 2048, %s45_s8, [#allocation5], %s259_s26, %s259_s26, %s260_s27  }
   0xa   :  { %254 = dma.done.wait [#allocation3], 128  }
   0xb   :  { %255 = vsyncadd [#allocation3], 4294967168 }
   0xc   :  { %256 = dma.done.wait [#allocation5], 2304  }
   0xd   :  { %257 = vsyncadd [#allocation5], 4294964992  ;;  %v67_v0 = vld [vmem:[#allocation4 + $0x8] sm:$0xff]  ;;  %v66_v1 = vld [vmem:[#allocation4] sm:$0xff]  ;;  %vm72_vm0 = vcmask 130048   ;;  %vm137_vm1 = vcmask 31744  }
   0xe   :  { %90 = vmatpush.msra.mxu0 %v67_v0  ;;  %v65_v2 = vld [vmem:[#allocation2] sm:$0xff]  ;;  %v112_v3 = vld [vmem:[#allocation6 + $0x78] sm:$0xff]  ;;  %v111_v4 = vld [vmem:[#allocation6 + $0x70] sm:$0xff] }
   0xf   :  { %117 = vmatpush.msra.mxu1 %v112_v3  ;;  %v110_v5 = vld [vmem:[#allocation6 + $0x68] sm:$0xff]  ;;  %v109_v6 = vld [vmem:[#allocation6 + $0x60] sm:$0xff]  ;;  %v108_v7 = vld [vmem:[#allocation6 + $0x58] sm:$0xff] }
  0x10   :  { %91 = vmatpush.msra.mxu0 %v66_v1  ;;  %v107_v8 = vld [vmem:[#allocation6 + $0x50] sm:$0xff]  ;;  %v106_v9 = vld [vmem:[#allocation6 + $0x48] sm:$0xff]  ;;  %v105_v10 = vld [vmem:[#allocation6 + $0x40] sm:$0xff] }
  0x11   :  { %170 = vmatmul.msk.f32.vlgmr.msra.gmra.mxu0 %vm72_vm0, %v65_v2  ;;  %118 = vmatpush.msra.mxu1 %v111_v4  ;;  %v104_v11 = vld [vmem:[#allocation6 + $0x38] sm:$0xff]  ;;  %v103_v12 = vld [vmem:[#allocation6 + $0x30] sm:$0xff]  ;;  %v102_v13 = vld [vmem:[#allocation6 + $0x28] sm:$0xff] }
  0x12   :  { %v101_v14 = vld [vmem:[#allocation6 + $0x20] sm:$0xff]  ;;  %v100_v15 = vld [vmem:[#allocation6 + $0x18] sm:$0xff]  ;;  %v99_v16 = vld [vmem:[#allocation6 + $0x10] sm:$0xff] }
  0x13   :  { %119 = vmatpush.msra.mxu1 %v110_v5  ;;  %v98_v17 = vld [vmem:[#allocation6 + $0x8] sm:$0xff]  ;;  %v97_v18 = vld [vmem:[#allocation6] sm:$0xff] }
  0x14   :  { %v176_v19 = vld [vmem:[%s316_s2] ss:$0 sm:$0xff] }
  0x15   :  { %120 = vmatpush.msra.mxu1 %v109_v6  ;;  %v177_v23 = vld [vmem:[%s318_s4] ss:$0 sm:$0xff] }
  0x17   :  { %121 = vmatpush.msra.mxu1 %v108_v7 }
  0x19   :  { %122 = vmatpush.msra.mxu1 %v107_v8 }
  0x1b   :  { %123 = vmatpush.msra.mxu1 %v106_v9 }
  0x1d   :  { %124 = vmatpush.msra.mxu1 %v105_v10 }
  0x1f   :  { %125 = vmatpush.msra.mxu1 %v104_v11 }
  0x21   :  { %126 = vmatpush.msra.mxu1 %v103_v12 }
  0x23   :  { %127 = vmatpush.msra.mxu1 %v102_v13 }
  0x25   :  { %128 = vmatpush.msra.mxu1 %v101_v14 }
  0x27   :  { %129 = vmatpush.msra.mxu1 %v100_v15 }
  0x29   :  { %130 = vmatpush.msra.mxu1 %v99_v16 }
  0x2b   :  { %131 = vmatpush.msra.mxu1 %v98_v17 }
  0x2d   :  { %132 = vmatpush.msra.mxu1 %v97_v18 }
  0x8e   :  { %v93_v20 = vpop.f32.mrf.mxu0 }
  0x8f   :  { %v94_v21 = vadd.f32 %v176_v19, %v93_v20 }
  0x91   :  { %v96_v22 = vmax.f32 %v94_v21, 0.0 }
  0x93   :  { %133 = vmatmul.f32.vlgmr.msra.gmra.mxu1 %v96_v22 }
 0x110   :  { %v134_v24 = vpop.f32.mrf.mxu1 }
 0x111   :  { %v135_v25 = vadd.f32 %v177_v23, %v134_v24 }
 0x113   :  { %v138_v26 = vsel %vm137_vm1, %v135_v25, -inf }
 0x114   :  { %139 = vmax.xlane.f32.xlu0 %v138_v26 }
 0x187   :  { %v140_v27 = vpop.xlane.xlu0 %139 }
 0x188   :  { %v141_v28 = vsub.f32 %v135_v25, %v140_v27 }
 0x18a   :  { %v142_v29 = vmul.f32 1.442695, %v141_v28 }
 0x18c   :  { %178 = vpow2.f32 %v142_v29 }
 0x192   :  { %v179_v30 = vpop.eup %178 }
 0x193   :  { %v144_v31 = vsel %vm137_vm1, %v179_v30, 0.0 }
 0x194   :  { %145 = vadd.xlane.f32.xlu0 %v144_v31 }
 0x207   :  { %v146_v32 = vpop.xlane.xlu0 %145 }
 0x208   :  { %180 = vrcp.f32 %v146_v32  ;;  %v158_v36 = vand.u32 2147483648, %v146_v32  ;;  %v156_v38 = vand.u32 2147483647, %v146_v32  ;;  %vm152_vm3 = vweird.f32 %v146_v32 }
 0x20a   :  { %v159_v40 = vor.u32 1.1754944e-38, %v158_v36  ;;  %vm157_vm5 = vcmp.eq.f32.partialorder %v156_v38, 8.507059e+37 }
 0x20e   :  { %v181_v33 = vpop.eup %180 }
 0x20f   :  { %v148_v34 = vmul.f32 %v181_v33, %v146_v32  ;;  %vm153_vm2 = vweird.f32 %v181_v33 }
 0x210   :  { %vm154_vm4 = vmor %vm152_vm3, %vm153_vm2 }
 0x211   :  { %v149_v35 = vsub.f32 1.0, %v148_v34 }
 0x213   :  { %v150_v37 = vmul.f32 %v181_v33, %v149_v35 }
 0x215   :  { %v151_v39 = vadd.f32 %v181_v33, %v150_v37 }
 0x217   :  { %v155_v41 = vsel %vm154_vm4, %v181_v33, %v151_v39 }
 0x218   :  { %v160_v42 = vsel %vm157_vm5, %v159_v40, %v155_v41 }
 0x219   :  { %v162_v43 = vmul.f32 %v179_v30, %v160_v42 }
 0x21b   :  { %163 = vst.msk [vmem:[%s319_s5] sm:$0xff] %vm137_vm1, %v162_v43 }
 0x21c   :  { %168 = vsyncpa [#allocation3], 1 }
 0x21d   :  { %169 = vsyncpa [#allocation5], 1 }

</bundles_post_ra>
